<compile_context>
chip_gen: v7x
topology: tpu7x:2x2x1
jax: 0.10.0
libtpu: 0.0.40
codegen_flags: <defaults>
</compile_context>

<pallas_src>
import functools

import jax
import jax.numpy as jnp
from jax.experimental import pallas as pl
from jax.experimental.pallas import tpu as pltpu

_LANE = 128          # minimum lane padding (v5e MXU width)
_NEG_FILL = -1e30    # "minus infinity" bias for padded softmax logits
_VMEM_RESIDENT_BUDGET = 40 * (1 << 20)  # conservative vs v7x 64 MiB per-TC VMEM


def _round_up(x, m):
    return (x + m - 1) // m * m


def _lane_multiple():
    """256 on v6e/v7x (2x256x256 MXU), 128 elsewhere (v5e 4x128x128)."""
    try:
        kind = jax.devices()[0].device_kind.lower()
    except Exception:
        return _LANE
    if "v6" in kind or "v7" in kind:
        return 256
    return _LANE


def _pad_dim(d, lane_mult):
    if d <= _LANE:
        return _LANE
    return _round_up(d, lane_mult)


def _pick_tile_m(batch):
    if batch >= 16:
        # At least two grid steps so both v7x TensorCores get work; cap at 512
        # (per-step overhead amortized, activation tile stays small).
        return int(min(512, _round_up(pl.cdiv(batch, 2), 8)))
    return int(_round_up(batch, 8))


def _pick_tk(d_in):
    for cand in (512, 256, 128):
        if d_in % cand == 0:
            return cand
    return d_in


# ---------------- Fused whole-network kernel (weights VMEM-resident) --------


def _fused_mlp_kernel(x_ref, *refs):
    """refs = (w0, b0, w1, b1, ..., w_{L-1}, b_{L-1}, o_ref)."""
    o_ref = refs[-1]
    wb_refs = refs[:-1]
    n_layers = len(wb_refs) // 2

    h = x_ref[...]  # bf16 (tile_m, in_dim)
    for li in range(n_layers):
        w = wb_refs[2 * li][...]       # bf16 (d_in_p, d_out_p), VMEM-resident
        b = wb_refs[2 * li + 1][...]   # f32  (1, d_out_p),      VMEM-resident
        y = jnp.dot(h, w, preferred_element_type=jnp.float32) + b
        if li < n_layers - 1:
            # LeakyReLU(0.2); Dropout == identity in eval mode. Keep h in bf16.
            h = jnp.where(y >= 0.0, y, 0.2 * y).astype(jnp.bfloat16)
        else:
            # Softmax over dim=1. Padded classes carry a -1e30 bias -> exp==0.
            m = jnp.max(y, axis=-1, keepdims=True)
            e = jnp.exp(y - m)
            denom = jnp.sum(e, axis=-1, keepdims=True)
            o_ref[...] = (e / denom).astype(o_ref.dtype)  # exact normalization


def _resident_spec(shape, single_buffer):
    """Constant-index (VMEM-resident) BlockSpec, single-buffered if possible."""
    index_map = lambda i: (0,) * len(shape)
    if single_buffer and hasattr(pl, "Buffered"):
        try:
            return pl.BlockSpec(shape, index_map, pipeline_mode=pl.Buffered(1))
        except TypeError:
            pass
    return pl.BlockSpec(shape, index_map)


def _fused_call(x, padded, tile_m, single_buffer_weights):
    batch, in_dim = x.shape
    out_p = padded[-1][0].shape[1]
    grid = (pl.cdiv(batch, tile_m),)

    in_specs = [pl.BlockSpec((tile_m, in_dim), lambda i: (i, 0))]
    flat = [x]
    for (w, b) in padded:
        in_specs.append(_resident_spec(tuple(w.shape), single_buffer_weights))
        in_specs.append(_resident_spec(tuple(b.shape), single_buffer_weights))
        flat += [w, b]

    # VMEM budget: resident weights/biases (+extra buffer unless single
    # buffered) + double-buffered x/out tiles + largest activation tile.
    wb_bytes = sum(int(w.size) * 2 + int(b.size) * 4 for w, b in padded)
    wb_bytes *= 1 if single_buffer_weights else 2
    max_dout = max(w.shape[1] for w, _ in padded)
    tile_bytes = tile_m * (in_dim * 2 * 2 + out_p * 4 * 2 + max_dout * (4 + 2))
    vmem_limit = int(min(128 << 20,
                         max(32 << 20, int((wb_bytes + tile_bytes) * 1.25))))

    flops = 2 * batch * sum(w.shape[0] * w.shape[1] for w, _ in padded)
    bytes_accessed = (int(x.size) * 2
                      + sum(int(w.size) * 2 + int(b.size) * 4 for w, b in padded)
                      + batch * out_p * 4)
    cost = pl.CostEstimate(flops=int(flops),
                           transcendentals=int(batch * out_p),
                           bytes_accessed=int(bytes_accessed))

    return pl.pallas_call(
        _fused_mlp_kernel,
        out_shape=jax.ShapeDtypeStruct((batch, out_p), jnp.float32),
        grid=grid,
        in_specs=in_specs,
        out_specs=pl.BlockSpec((tile_m, out_p), lambda i: (i, 0)),
        compiler_params=pltpu.CompilerParams(
            dimension_semantics=("parallel",),   # batch tiles -> megacore
            vmem_limit_bytes=vmem_limit,
        ),
        cost_estimate=cost,
    )(*flat)


def _fused_forward(x, padded, tile_m):
    try:
        return _fused_call(x, padded, tile_m, single_buffer_weights=True)
    except Exception:
        # Older Pallas without pipeline_mode / Buffered(1): default buffering.
        return _fused_call(x, padded, tile_m, single_buffer_weights=False)


# ---------------- Streaming fallback (weights too big for VMEM residency) ---


def _streaming_layer_kernel(x_ref, w_ref, b_ref, o_ref, acc_ref, *, last_layer):
    k = pl.program_id(1)

    @pl.when(k == 0)
    def _():
        acc_ref[...] = jnp.zeros_like(acc_ref)

    acc_ref[...] += jnp.dot(x_ref[...], w_ref[...],
                            preferred_element_type=jnp.float32)

    @pl.when(k == pl.num_programs(1) - 1)
    def _():
        y = acc_ref[...] + b_ref[...]
        if last_layer:
            m = jnp.max(y, axis=-1, keepdims=True)
            e = jnp.exp(y - m)
            o_ref[...] = (e / jnp.sum(e, axis=-1, keepdims=True)).astype(o_ref.dtype)
        else:
            o_ref[...] = jnp.where(y >= 0.0, y, 0.2 * y).astype(o_ref.dtype)


def _streaming_layer_call(h, w, b, *, last_layer, tile_m):
    batch, d_in = h.shape
    d_out_p = w.shape[1]
    tk = _pick_tk(d_in)
    grid = (pl.cdiv(batch, tile_m), d_in // tk)
    out_dtype = jnp.float32 if last_layer else jnp.bfloat16
    out_isz = 4 if last_layer else 2

    tile_bytes = (2 * tile_m * tk * 2 + 2 * tk * d_out_p * 2 + 2 * d_out_p * 4
                  + 2 * tile_m * d_out_p * out_isz + tile_m * d_out_p * 4)
    vmem_limit = int(min(128 << 20, max(32 << 20, int(tile_bytes * 1.25))))

    kernel = functools.partial(_streaming_layer_kernel, last_layer=last_layer)
    return pl.pallas_call(
        kernel,
        out_shape=jax.ShapeDtypeStruct((batch, d_out_p), out_dtype),
        grid=grid,
        in_specs=[
            pl.BlockSpec((tile_m, tk), lambda i, k: (i, k)),
            pl.BlockSpec((tk, d_out_p), lambda i, k: (k, 0)),
            pl.BlockSpec((1, d_out_p), lambda i, k: (0, 0)),
        ],
        out_specs=pl.BlockSpec((tile_m, d_out_p), lambda i, k: (i, 0)),
        scratch_shapes=[pltpu.VMEM((tile_m, d_out_p), jnp.float32)],
        compiler_params=pltpu.CompilerParams(
            dimension_semantics=("parallel", "arbitrary"),
            vmem_limit_bytes=vmem_limit,
        ),
    )(h, w, b)


def _streaming_forward(x, padded, tile_m):
    h = x
    n = len(padded)
    for i, (w, b) in enumerate(padded):
        h = _streaming_layer_call(h, w, b, last_layer=(i == n - 1), tile_m=tile_m)
    return h


# ---------------- Parameter padding ------------------------------------------


def _pad_params(params, lane_mult):
    """Pad (w [d_in,d_out] f32, b [1,d_out] f32) for the TPU kernels.

    Weights -> bf16, zero-padded (padded rows/cols contribute nothing).
    Biases stay f32; the LAST layer's padded class positions get -1e30 so the
    softmax assigns them zero probability.  The first layer keeps the raw
    input feature dim so x never needs host-side feature padding.
    """
    n = len(params)
    padded = []
    for i, (w, b) in enumerate(params):
        d_in, d_out = w.shape
        d_in_p = d_in if i == 0 else _pad_dim(d_in, lane_mult)
        d_out_p = _pad_dim(d_out, lane_mult)
        w_p = (jnp.zeros((d_in_p, d_out_p), jnp.bfloat16)
               .at[:d_in, :d_out].set(w.astype(jnp.bfloat16)))
        fill = _NEG_FILL if i == n - 1 else 0.0
        b_p = jnp.full((1, d_out_p), fill, jnp.float32).at[:, :d_out].set(b)
        padded.append((w_p, b_p))
    return tuple(padded)


# ---------------- Public forward ---------------------------------------------


def multilayer_ffn_forward(x, params, force_streaming=False):
    """Mirrors MultiLayerFeedForwardNN.forward (eval mode)."""
    out_dim = params[-1][0].shape[1]
    lane_mult = _lane_multiple()
    padded = _pad_params(params, lane_mult)
    tile_m = _pick_tile_m(x.shape[0])
    x_bf16 = x.astype(jnp.bfloat16)   # half the per-tile input DMA bytes

    resident_bytes = sum(int(w.size) * 2 + int(b.size) * 4 for w, b in padded)
    if force_streaming or resident_bytes > _VMEM_RESIDENT_BUDGET:
        out_p = _streaming_forward(x_bf16, padded, tile_m)
    else:
        out_p = _fused_forward(x_bf16, padded, tile_m)
    return out_p[:, :out_dim]


# ---------------- Parameter init (matches PyTorch module shapes) ------------


def _xavier_uniform(key, fan_in, fan_out):
    # nn.init.xavier_uniform_ on a (fan_out, fan_in) weight; stored transposed.
    limit = jnp.sqrt(6.0 / (fan_in + fan_out))
    w = jax.random.uniform(key, (fan_out, fan_in), jnp.float32, -limit, limit)
    return w.T  # -> (fan_in, fan_out)


def _linear_bias(key, fan_in, fan_out):
    # PyTorch default Linear bias init: U(-1/sqrt(fan_in), 1/sqrt(fan_in))
    bound = 1.0 / jnp.sqrt(jnp.float32(fan_in))
    return jax.random.uniform(key, (1, fan_out), jnp.float32, -bound, bound)


def init_params(key, input_dim, output_dim, hidden_dim, num_hidden_layers):
    dims = [input_dim] + [hidden_dim] * (num_hidden_layers + 1) + [output_dim]
    params = []
    for i in range(len(dims) - 1):
        key, kw, kb = jax.random.split(key, 3)
        params.append(
            (_xavier_uniform(kw, dims[i], dims[i + 1]),
             _linear_bias(kb, dims[i], dims[i + 1]))
        )
    return params


# ---------------- Pure-JAX reference (same bf16 matmul semantics) -----------


def _reference_forward(x, params):
    n = len(params)
    h = x
    for i, (w, b) in enumerate(params):
        y = jnp.dot(h.astype(jnp.bfloat16), w.astype(jnp.bfloat16),
                    preferred_element_type=jnp.float32) + b
        if i < n - 1:
            h = jnp.where(y >= 0, y, 0.2 * y)
        else:
            h = jax.nn.softmax(y, axis=1)
    return h


# ---------------- Demo ------------------------------------------------------

if __name__ == "__main__":
    key = jax.random.PRNGKey(0)

    batch = 8
    input_dim = 16
    hidden_dim = 32
    output_dim = 8
    num_hidden_layers = 1

    key, kx, kp = jax.random.split(key, 3)
    x = jax.random.normal(kx, (batch, input_dim), jnp.float32)
    params = init_params(kp, input_dim, output_dim, hidden_dim, num_hidden_layers)

    ref = jax.block_until_ready(_reference_forward(x, params))

    # Primary fused path (weights VMEM-resident).
    out = jax.block_until_ready(multilayer_ffn_forward(x, params))
    assert out.shape == (batch, output_dim)
    assert jnp.allclose(jnp.sum(out, axis=1), 1.0, atol=1e-4), \
        float(jnp.max(jnp.abs(jnp.sum(out, axis=1) - 1.0)))
    assert jnp.allclose(out, ref, atol=1e-2), float(jnp.max(jnp.abs(out - ref)))

    # Streaming fallback path (used automatically when weights exceed the
    # per-TensorCore VMEM budget, e.g. large hidden_dim on v7x).
    out_s = jax.block_until_ready(
        multilayer_ffn_forward(x, params, force_streaming=True))
    assert out_s.shape == (batch, output_dim)
    assert jnp.allclose(jnp.sum(out_s, axis=1), 1.0, atol=1e-4)
    assert jnp.allclose(out_s, ref, atol=1e-2), float(jnp.max(jnp.abs(out_s - ref)))

    print("KERNEL_OK")
</pallas_src>

<mosaic_0001>
module attributes {stable_mosaic.version = 11 : i64} {
  func.func @_fused_mlp_kernel(%arg0: i32, %arg1: memref<8x16xbf16, #tpu.memory_space<vmem>>, %arg2: memref<16x128xbf16, #tpu.memory_space<vmem>>, %arg3: memref<1x128xf32, #tpu.memory_space<vmem>>, %arg4: memref<128x128xbf16, #tpu.memory_space<vmem>>, %arg5: memref<1x128xf32, #tpu.memory_space<vmem>>, %arg6: memref<128x128xbf16, #tpu.memory_space<vmem>>, %arg7: memref<1x128xf32, #tpu.memory_space<vmem>>, %arg8: memref<8x128xf32, #tpu.memory_space<vmem>>) attributes {dimension_semantics = [#tpu.dimension_semantics<parallel>], iteration_bounds = array<i64: 1>, scalar_prefetch = 0 : i64, scratch_operands = 0 : i64, tpu.core_type = #tpu.core_type<tc>, window_params = [{transform_indices = @transform_0, window_bounds = array<i64: 8, 16>}, {pipeline_mode = #tpu.pipeline_mode<synchronous>, transform_indices = @transform_1, window_bounds = array<i64: 16, 128>}, {pipeline_mode = #tpu.pipeline_mode<synchronous>, transform_indices = @transform_2, window_bounds = array<i64: 1, 128>}, {pipeline_mode = #tpu.pipeline_mode<synchronous>, transform_indices = @transform_3, window_bounds = array<i64: 128, 128>}, {pipeline_mode = #tpu.pipeline_mode<synchronous>, transform_indices = @transform_4, window_bounds = array<i64: 1, 128>}, {pipeline_mode = #tpu.pipeline_mode<synchronous>, transform_indices = @transform_5, window_bounds = array<i64: 128, 128>}, {pipeline_mode = #tpu.pipeline_mode<synchronous>, transform_indices = @transform_6, window_bounds = array<i64: 1, 128>}, {transform_indices = @transform_7, window_bounds = array<i64: 8, 128>}]} {
    %c0 = arith.constant 0 : index
    %c0_0 = arith.constant 0 : index
    %0 = vector.load %arg1[%c0, %c0_0] : memref<8x16xbf16, #tpu.memory_space<vmem>>, vector<8x16xbf16>
    %c0_1 = arith.constant 0 : index
    %c0_2 = arith.constant 0 : index
    %1 = vector.load %arg2[%c0_1, %c0_2] : memref<16x128xbf16, #tpu.memory_space<vmem>>, vector<16x128xbf16>
    %c0_3 = arith.constant 0 : index
    %c0_4 = arith.constant 0 : index
    %2 = vector.load %arg3[%c0_3, %c0_4] : memref<1x128xf32, #tpu.memory_space<vmem>>, vector<1x128xf32>
    %cst = arith.constant dense<0.000000e+00> : vector<8x128xf32>
    %3 = tpu.matmul %0, %1, %cst {dimension_numbers = #tpu.dot_dimension_numbers<[1], [0], [0], [1], [0, 0, 1, 1], [], []>} : vector<8x16xbf16>, vector<16x128xbf16>, vector<8x128xf32> -> vector<8x128xf32>
    %4 = vector.broadcast %2 : vector<1x128xf32> to vector<8x128xf32>
    %5 = arith.addf %3, %4 : vector<8x128xf32>
    %cst_5 = arith.constant 0.000000e+00 : f32
    %6 = vector.broadcast %cst_5 : f32 to vector<8x128xf32>
    %7 = arith.cmpf oge, %5, %6 : vector<8x128xf32>
    %cst_6 = arith.constant 2.000000e-01 : f32
    %8 = vector.broadcast %cst_6 : f32 to vector<8x128xf32>
    %9 = arith.mulf %8, %5 : vector<8x128xf32>
    %10 = arith.select %7, %5, %9 : vector<8x128xi1>, vector<8x128xf32>
    %11 = arith.truncf %10 : vector<8x128xf32> to vector<8x128xbf16>
    %c0_7 = arith.constant 0 : index
    %c0_8 = arith.constant 0 : index
    %12 = vector.load %arg4[%c0_7, %c0_8] : memref<128x128xbf16, #tpu.memory_space<vmem>>, vector<128x128xbf16>
    %c0_9 = arith.constant 0 : index
    %c0_10 = arith.constant 0 : index
    %13 = vector.load %arg5[%c0_9, %c0_10] : memref<1x128xf32, #tpu.memory_space<vmem>>, vector<1x128xf32>
    %cst_11 = arith.constant dense<0.000000e+00> : vector<8x128xf32>
    %14 = tpu.matmul %11, %12, %cst_11 {dimension_numbers = #tpu.dot_dimension_numbers<[1], [0], [0], [1], [0, 0, 1, 1], [], []>} : vector<8x128xbf16>, vector<128x128xbf16>, vector<8x128xf32> -> vector<8x128xf32>
    %15 = vector.broadcast %13 : vector<1x128xf32> to vector<8x128xf32>
    %16 = arith.addf %14, %15 : vector<8x128xf32>
    %cst_12 = arith.constant 0.000000e+00 : f32
    %17 = vector.broadcast %cst_12 : f32 to vector<8x128xf32>
    %18 = arith.cmpf oge, %16, %17 : vector<8x128xf32>
    %cst_13 = arith.constant 2.000000e-01 : f32
    %19 = vector.broadcast %cst_13 : f32 to vector<8x128xf32>
    %20 = arith.mulf %19, %16 : vector<8x128xf32>
    %21 = arith.select %18, %16, %20 : vector<8x128xi1>, vector<8x128xf32>
    %22 = arith.truncf %21 : vector<8x128xf32> to vector<8x128xbf16>
    %c0_14 = arith.constant 0 : index
    %c0_15 = arith.constant 0 : index
    %23 = vector.load %arg6[%c0_14, %c0_15] : memref<128x128xbf16, #tpu.memory_space<vmem>>, vector<128x128xbf16>
    %c0_16 = arith.constant 0 : index
    %c0_17 = arith.constant 0 : index
    %24 = vector.load %arg7[%c0_16, %c0_17] : memref<1x128xf32, #tpu.memory_space<vmem>>, vector<1x128xf32>
    %cst_18 = arith.constant dense<0.000000e+00> : vector<8x128xf32>
    %25 = tpu.matmul %22, %23, %cst_18 {dimension_numbers = #tpu.dot_dimension_numbers<[1], [0], [0], [1], [0, 0, 1, 1], [], []>} : vector<8x128xbf16>, vector<128x128xbf16>, vector<8x128xf32> -> vector<8x128xf32>
    %26 = vector.broadcast %24 : vector<1x128xf32> to vector<8x128xf32>
    %27 = arith.addf %25, %26 : vector<8x128xf32>
    %cst_19 = arith.constant dense<0xFF800000> : vector<8xf32>
    %28 = vector.multi_reduction <maximumf>, %27, %cst_19 [1] : vector<8x128xf32> to vector<8xf32>
    %29 = vector.shape_cast %28 : vector<8xf32> to vector<8x1xf32>
    %30 = vector.broadcast %29 : vector<8x1xf32> to vector<8x128xf32>
    %31 = arith.subf %27, %30 : vector<8x128xf32>
    %32 = math.exp %31 : vector<8x128xf32>
    %cst_20 = arith.constant dense<0.000000e+00> : vector<8xf32>
    %33 = vector.multi_reduction <add>, %32, %cst_20 [1] : vector<8x128xf32> to vector<8xf32>
    %34 = vector.shape_cast %33 : vector<8xf32> to vector<8x1xf32>
    %35 = vector.broadcast %34 : vector<8x1xf32> to vector<8x128xf32>
    %36 = arith.divf %32, %35 : vector<8x128xf32>
    %c0_21 = arith.constant 0 : index
    %c0_22 = arith.constant 0 : index
    %37 = vector.load %arg8[%c0_21, %c0_22] : memref<8x128xf32, #tpu.memory_space<vmem>>, vector<8x128xf32>
    tpu.vector_store %arg8[%c0_21, %c0_22], %36 {strides = array<i32>} : memref<8x128xf32, #tpu.memory_space<vmem>>, vector<8x128xf32>,
    return
  }
  func.func @transform_0(%arg0: i32) -> (i32, i32) {
    %c0_i32 = arith.constant 0 : i32
    %c0_i32_0 = arith.constant 0 : i32
    return %arg0, %c0_i32 : i32, i32
  }
  func.func @transform_1(%arg0: i32) -> (i32, i32) {
    %c0_i32 = arith.constant 0 : i32
    %c0_i32_0 = arith.constant 0 : i32
    %c0_i32_1 = arith.constant 0 : i32
    return %c0_i32, %c0_i32_0 : i32, i32
  }
  func.func @transform_2(%arg0: i32) -> (i32, i32) {
    %c0_i32 = arith.constant 0 : i32
    %c0_i32_0 = arith.constant 0 : i32
    %c0_i32_1 = arith.constant 0 : i32
    return %c0_i32, %c0_i32_0 : i32, i32
  }
  func.func @transform_3(%arg0: i32) -> (i32, i32) {
    %c0_i32 = arith.constant 0 : i32
    %c0_i32_0 = arith.constant 0 : i32
    %c0_i32_1 = arith.constant 0 : i32
    return %c0_i32, %c0_i32_0 : i32, i32
  }
  func.func @transform_4(%arg0: i32) -> (i32, i32) {
    %c0_i32 = arith.constant 0 : i32
    %c0_i32_0 = arith.constant 0 : i32
    %c0_i32_1 = arith.constant 0 : i32
    return %c0_i32, %c0_i32_0 : i32, i32
  }
  func.func @transform_5(%arg0: i32) -> (i32, i32) {
    %c0_i32 = arith.constant 0 : i32
    %c0_i32_0 = arith.constant 0 : i32
    %c0_i32_1 = arith.constant 0 : i32
    return %c0_i32, %c0_i32_0 : i32, i32
  }
  func.func @transform_6(%arg0: i32) -> (i32, i32) {
    %c0_i32 = arith.constant 0 : i32
    %c0_i32_0 = arith.constant 0 : i32
    %c0_i32_1 = arith.constant 0 : i32
    return %c0_i32, %c0_i32_0 : i32, i32
  }
  func.func @transform_7(%arg0: i32) -> (i32, i32) {
    %c0_i32 = arith.constant 0 : i32
    %c0_i32_0 = arith.constant 0 : i32
    return %arg0, %c0_i32 : i32, i32
  }
}

module attributes {stable_mosaic.version = 11 : i64} {
  func.func @_fused_mlp_kernel(%arg0: i32, %arg1: memref<8x16xbf16, #tpu.memory_space<vmem>>, %arg2: memref<16x128xbf16, #tpu.memory_space<vmem>>, %arg3: memref<1x128xf32, #tpu.memory_space<vmem>>, %arg4: memref<128x128xbf16, #tpu.memory_space<vmem>>, %arg5: memref<1x128xf32, #tpu.memory_space<vmem>>, %arg6: memref<128x128xbf16, #tpu.memory_space<vmem>>, %arg7: memref<1x128xf32, #tpu.memory_space<vmem>>, %arg8: memref<8x128xf32, #tpu.memory_space<vmem>>) attributes {dimension_semantics = [#tpu.dimension_semantics<parallel>], iteration_bounds = array<i64: 1>, scalar_prefetch = 0 : i64, scratch_operands = 0 : i64, tpu.core_type = #tpu.core_type<tc>, window_params = [{transform_indices = @transform_0, window_bounds = array<i64: 8, 16>}, {pipeline_mode = #tpu.pipeline_mode<synchronous>, transform_indices = @transform_1, window_bounds = array<i64: 16, 128>}, {pipeline_mode = #tpu.pipeline_mode<synchronous>, transform_indices = @transform_2, window_bounds = array<i64: 1, 128>}, {pipeline_mode = #tpu.pipeline_mode<synchronous>, transform_indices = @transform_3, window_bounds = array<i64: 128, 128>}, {pipeline_mode = #tpu.pipeline_mode<synchronous>, transform_indices = @transform_4, window_bounds = array<i64: 1, 128>}, {pipeline_mode = #tpu.pipeline_mode<synchronous>, transform_indices = @transform_5, window_bounds = array<i64: 128, 128>}, {pipeline_mode = #tpu.pipeline_mode<synchronous>, transform_indices = @transform_6, window_bounds = array<i64: 1, 128>}, {transform_indices = @transform_7, window_bounds = array<i64: 8, 128>}]} {
    %c0 = arith.constant 0 : index
    %c0_0 = arith.constant 0 : index
    %0 = vector.load %arg1[%c0, %c0_0] : memref<8x16xbf16, #tpu.memory_space<vmem>>, vector<8x16xbf16>
    %c0_1 = arith.constant 0 : index
    %c0_2 = arith.constant 0 : index
    %1 = vector.load %arg2[%c0_1, %c0_2] : memref<16x128xbf16, #tpu.memory_space<vmem>>, vector<16x128xbf16>
    %c0_3 = arith.constant 0 : index
    %c0_4 = arith.constant 0 : index
    %2 = vector.load %arg3[%c0_3, %c0_4] : memref<1x128xf32, #tpu.memory_space<vmem>>, vector<1x128xf32>
    %cst = arith.constant dense<0.000000e+00> : vector<8x128xf32>
    %3 = tpu.matmul %0, %1, %cst {dimension_numbers = #tpu.dot_dimension_numbers<[1], [0], [0], [1], [0, 0, 1, 1], [], []>} : vector<8x16xbf16>, vector<16x128xbf16>, vector<8x128xf32> -> vector<8x128xf32>
    %4 = vector.broadcast %2 : vector<1x128xf32> to vector<8x128xf32>
    %5 = arith.addf %3, %4 : vector<8x128xf32>
    %cst_5 = arith.constant 0.000000e+00 : f32
    %6 = vector.broadcast %cst_5 : f32 to vector<8x128xf32>
    %7 = arith.cmpf oge, %5, %6 : vector<8x128xf32>
    %cst_6 = arith.constant 2.000000e-01 : f32
    %8 = vector.broadcast %cst_6 : f32 to vector<8x128xf32>
    %9 = arith.mulf %8, %5 : vector<8x128xf32>
    %10 = arith.select %7, %5, %9 : vector<8x128xi1>, vector<8x128xf32>
    %11 = arith.truncf %10 : vector<8x128xf32> to vector<8x128xbf16>
    %c0_7 = arith.constant 0 : index
    %c0_8 = arith.constant 0 : index
    %12 = vector.load %arg4[%c0_7, %c0_8] : memref<128x128xbf16, #tpu.memory_space<vmem>>, vector<128x128xbf16>
    %c0_9 = arith.constant 0 : index
    %c0_10 = arith.constant 0 : index
    %13 = vector.load %arg5[%c0_9, %c0_10] : memref<1x128xf32, #tpu.memory_space<vmem>>, vector<1x128xf32>
    %cst_11 = arith.constant dense<0.000000e+00> : vector<8x128xf32>
    %14 = tpu.matmul %11, %12, %cst_11 {dimension_numbers = #tpu.dot_dimension_numbers<[1], [0], [0], [1], [0, 0, 1, 1], [], []>} : vector<8x128xbf16>, vector<128x128xbf16>, vector<8x128xf32> -> vector<8x128xf32>
    %15 = vector.broadcast %13 : vector<1x128xf32> to vector<8x128xf32>
    %16 = arith.addf %14, %15 : vector<8x128xf32>
    %cst_12 = arith.constant 0.000000e+00 : f32
    %17 = vector.broadcast %cst_12 : f32 to vector<8x128xf32>
    %18 = arith.cmpf oge, %16, %17 : vector<8x128xf32>
    %cst_13 = arith.constant 2.000000e-01 : f32
    %19 = vector.broadcast %cst_13 : f32 to vector<8x128xf32>
    %20 = arith.mulf %19, %16 : vector<8x128xf32>
    %21 = arith.select %18, %16, %20 : vector<8x128xi1>, vector<8x128xf32>
    %22 = arith.truncf %21 : vector<8x128xf32> to vector<8x128xbf16>
    %c0_14 = arith.constant 0 : index
    %c0_15 = arith.constant 0 : index
    %23 = vector.load %arg6[%c0_14, %c0_15] : memref<128x128xbf16, #tpu.memory_space<vmem>>, vector<128x128xbf16>
    %c0_16 = arith.constant 0 : index
    %c0_17 = arith.constant 0 : index
    %24 = vector.load %arg7[%c0_16, %c0_17] : memref<1x128xf32, #tpu.memory_space<vmem>>, vector<1x128xf32>
    %cst_18 = arith.constant dense<0.000000e+00> : vector<8x128xf32>
    %25 = tpu.matmul %22, %23, %cst_18 {dimension_numbers = #tpu.dot_dimension_numbers<[1], [0], [0], [1], [0, 0, 1, 1], [], []>} : vector<8x128xbf16>, vector<128x128xbf16>, vector<8x128xf32> -> vector<8x128xf32>
    %26 = vector.broadcast %24 : vector<1x128xf32> to vector<8x128xf32>
    %27 = arith.addf %25, %26 : vector<8x128xf32>
    %cst_19 = arith.constant dense<0xFF800000> : vector<8xf32>
    %28 = vector.multi_reduction <maximumf>, %27, %cst_19 [1] : vector<8x128xf32> to vector<8xf32>
    %29 = vector.shape_cast %28 : vector<8xf32> to vector<8x1xf32>
    %30 = vector.broadcast %29 : vector<8x1xf32> to vector<8x128xf32>
    %31 = arith.subf %27, %30 : vector<8x128xf32>
    %32 = math.exp %31 : vector<8x128xf32>
    %cst_20 = arith.constant dense<0.000000e+00> : vector<8xf32>
    %33 = vector.multi_reduction <add>, %32, %cst_20 [1] : vector<8x128xf32> to vector<8xf32>
    %34 = vector.shape_cast %33 : vector<8xf32> to vector<8x1xf32>
    %35 = vector.broadcast %34 : vector<8x1xf32> to vector<8x128xf32>
    %36 = arith.divf %32, %35 : vector<8x128xf32>
    %c0_21 = arith.constant 0 : index
    %c0_22 = arith.constant 0 : index
    %37 = vector.load %arg8[%c0_21, %c0_22] : memref<8x128xf32, #tpu.memory_space<vmem>>, vector<8x128xf32>
    tpu.vector_store %arg8[%c0_21, %c0_22], %36 {strides = array<i32>} : memref<8x128xf32, #tpu.memory_space<vmem>>, vector<8x128xf32>,
    return
  }
  func.func @transform_0(%arg0: i32) -> (i32, i32) {
    %c0_i32 = arith.constant 0 : i32
    %c0_i32_0 = arith.constant 0 : i32
    return %arg0, %c0_i32 : i32, i32
  }
  func.func @transform_1(%arg0: i32) -> (i32, i32) {
    %c0_i32 = arith.constant 0 : i32
    %c0_i32_0 = arith.constant 0 : i32
    %c0_i32_1 = arith.constant 0 : i32
    return %c0_i32, %c0_i32_0 : i32, i32
  }
  func.func @transform_2(%arg0: i32) -> (i32, i32) {
    %c0_i32 = arith.constant 0 : i32
    %c0_i32_0 = arith.constant 0 : i32
    %c0_i32_1 = arith.constant 0 : i32
    return %c0_i32, %c0_i32_0 : i32, i32
  }
  func.func @transform_3(%arg0: i32) -> (i32, i32) {
    %c0_i32 = arith.constant 0 : i32
    %c0_i32_0 = arith.constant 0 : i32
    %c0_i32_1 = arith.constant 0 : i32
    return %c0_i32, %c0_i32_0 : i32, i32
  }
  func.func @transform_4(%arg0: i32) -> (i32, i32) {
    %c0_i32 = arith.constant 0 : i32
    %c0_i32_0 = arith.constant 0 : i32
    %c0_i32_1 = arith.constant 0 : i32
    return %c0_i32, %c0_i32_0 : i32, i32
  }
  func.func @transform_5(%arg0: i32) -> (i32, i32) {
    %c0_i32 = arith.constant 0 : i32
    %c0_i32_0 = arith.constant 0 : i32
    %c0_i32_1 = arith.constant 0 : i32
    return %c0_i32, %c0_i32_0 : i32, i32
  }
  func.func @transform_6(%arg0: i32) -> (i32, i32) {
    %c0_i32 = arith.constant 0 : i32
    %c0_i32_0 = arith.constant 0 : i32
    %c0_i32_1 = arith.constant 0 : i32
    return %c0_i32, %c0_i32_0 : i32, i32
  }
  func.func @transform_7(%arg0: i32) -> (i32, i32) {
    %c0_i32 = arith.constant 0 : i32
    %c0_i32_0 = arith.constant 0 : i32
    return %arg0, %c0_i32 : i32, i32
  }
}

</mosaic_0001>

<bundles_post_ra>
// kernel: tpu_custom_call.1
= control target key start
LH: loop header
LB: loop body
LE: loop exit
PB: predicated region body
PF: predicated region fallthrough
CT: control target
= control target key end

     0   :  { %12 = vsyncpa [#allocation3], 0  ;;  %s780_s0 = inlined_call_operand.hbm [shape: bf16[8,16], index: 0, kind: input, shape index: {}]   ;;  %s781_s1 = inlined_call_operand.hbm [shape: bf16[16,128], index: 1, kind: input, shape index: {}]   ;;  %s782_s2 = inlined_call_operand.vmem [shape: f32[1,128], index: 2, kind: input, shape index: {}]   ;;  %s783_s3 = inlined_call_operand.hbm [shape: bf16[128,128], index: 3, kind: input, shape index: {}]   ;;  %s784_s4 = inlined_call_operand.vmem [shape: f32[1,128], index: 4, kind: input, shape index: {}]   ;;  %s785_s5 = inlined_call_operand.hbm [shape: bf16[128,128], index: 5, kind: input, shape index: {}]   ;;  %s786_s6 = inlined_call_operand.vmem [shape: f32[1,128], index: 6, kind: input, shape index: {}]   ;;  %s787_s7 = inlined_call_operand.hbm [shape: f32[8,128], index: 7, kind: output, shape index: {}]  }
   0x1   :  { %13 = vsyncpa [#allocation6], 0 }
   0x2   :  { %14 = vsyncpa [#allocation9], 0 }
   0x3   :  { %15 = vsyncpa [#allocation4], 0  ;;  %s633_s24 = smov [#allocation5]   ;;  %s515_s28 = scalar_lea.hbm %s781_s1, 128 }
   0x4   :  { %s31_s25 = sshll.u32 %s633_s24, 4  ;;  %p516_p0 = scmp.ne.s32.totalorder %s781_s1, %s515_s28  ;;  %s32_s25 = int_to_ptr.vmem [resolvable:$true] %s31_s25 }
   0x5   :  { %p519_p1 = scmp.lt.u32.totalorder %s515_s28, %s781_s1 }
   0x7   :  { %p521_p2 = pnand %p519_p1, %p516_p0 }
   0x9   :  { %524 = shalt.err (!%p521_p2)
}
   0xa   :  { %s525_s10 = scalar_lea.vmem %s32_s25, 128  ;;  %p530_p4 = scmp.lt.s32.totalorder %s32_s25, %s32_s25 }
   0xb   :  { %p526_p3 = scmp.ne.s32.totalorder %s32_s25, %s525_s10  ;;  %p531_p5 = scmp.lt.s32.totalorder %s525_s10, %s525_s10 }
   0xd   :  { %p532_p6 = por %p531_p5, %p530_p4 }
   0xf   :  { %p533_p7 = pnand %p532_p6, %p526_p3 }
  0x11   :  { %536 = shalt.err (!%p533_p7)
}
  0x12   :  { %s634_s11 = smov 64   ;;  %s635_s12 = smov 4  }
  0x13   :  { %37 = dma.hbm_to_vmem [thread:$0]  %s781_s1, 128, %s32_s25, [#allocation6], %s634_s11, %s634_s11, %s635_s12  }
  0x14   :  { %s636_s15 = smov [#allocation2]   ;;  %s637_s17 = smov [#allocation7]  }
  0x15   :  { %s22_s16 = sshll.u32 %s636_s15, 4  ;;  %s45_s18 = sshll.u32 %s637_s17, 4  ;;  %s23_s16 = int_to_ptr.vmem [resolvable:$true] %s22_s16  ;;  %s46_s18 = int_to_ptr.vmem [resolvable:$true] %s45_s18 }
  0x16   :  { %s537_s21 = scalar_lea.hbm %s780_s0, 64 }
  0x17   :  { %p538_p8 = scmp.ne.s32.totalorder %s780_s0, %s537_s21  ;;  %p541_p9 = scmp.lt.u32.totalorder %s537_s21, %s780_s0 }
  0x19   :  { %p543_p10 = pnand %p541_p9, %p538_p8 }
  0x1b   :  { %546 = shalt.err (!%p543_p10)
}
  0x1c   :  { %s547_s1 = scalar_lea.vmem %s23_s16, 64  ;;  %p552_p12 = scmp.lt.s32.totalorder %s23_s16, %s23_s16 }
  0x1d   :  { %p548_p11 = scmp.ne.s32.totalorder %s23_s16, %s547_s1  ;;  %p553_p13 = scmp.lt.s32.totalorder %s547_s1, %s547_s1 }
  0x1f   :  { %p554_p0 = por %p553_p13, %p552_p12 }
  0x21   :  { %p555_p1 = pnand %p554_p0, %p548_p11 }
  0x23   :  { %558 = shalt.err (!%p555_p1)
}
  0x24   :  { %25 = dma.hbm_to_vmem [thread:$0]  %s780_s0, 64, %s23_s16, [#allocation3]  }
  0x25   :  { %s559_s30 = scalar_lea.hbm %s783_s3, 1024 }
  0x26   :  { %p560_p2 = scmp.ne.s32.totalorder %s783_s3, %s559_s30  ;;  %p563_p3 = scmp.lt.u32.totalorder %s559_s30, %s783_s3 }
  0x28   :  { %p565_p4 = pnand %p563_p3, %p560_p2 }
  0x2a   :  { %568 = shalt.err (!%p565_p4)
}
  0x2b   :  { %s569_s14 = scalar_lea.vmem %s46_s18, 1024  ;;  %p574_p6 = scmp.lt.s32.totalorder %s46_s18, %s46_s18 }
  0x2c   :  { %p570_p5 = scmp.ne.s32.totalorder %s46_s18, %s569_s14  ;;  %p575_p7 = scmp.lt.s32.totalorder %s569_s14, %s569_s14 }
  0x2e   :  { %p576_p8 = por %p575_p7, %p574_p6 }
  0x30   :  { %p577_p9 = pnand %p576_p8, %p570_p5 }
  0x32   :  { %580 = shalt.err (!%p577_p9)
}
  0x33   :  { %51 = dma.hbm_to_vmem [thread:$0]  %s783_s3, 1024, %s46_s18, [#allocation6], %s634_s11, %s634_s11, %s635_s12  }
  0x34   :  { %s638_s16 = smov [#allocation8]   ;;  %s581_s21 = scalar_lea.hbm %s785_s5, 1024 }
  0x35   :  { %s59_s17 = sshll.u32 %s638_s16, 4  ;;  %p582_p10 = scmp.ne.s32.totalorder %s785_s5, %s581_s21  ;;  %s60_s17 = int_to_ptr.vmem [resolvable:$true] %s59_s17 }
  0x36   :  { %p585_p11 = scmp.lt.u32.totalorder %s581_s21, %s785_s5 }
  0x38   :  { %p587_p12 = pnand %p585_p11, %p582_p10 }
  0x3a   :  { %590 = shalt.err (!%p587_p12)
}
  0x3b   :  { %s591_s1 = scalar_lea.vmem %s60_s17, 1024  ;;  %p596_p0 = scmp.lt.s32.totalorder %s60_s17, %s60_s17 }
  0x3c   :  { %p592_p13 = scmp.ne.s32.totalorder %s60_s17, %s591_s1  ;;  %p597_p1 = scmp.lt.s32.totalorder %s591_s1, %s591_s1 }
  0x3e   :  { %p598_p2 = por %p597_p1, %p596_p0 }
  0x40   :  { %p599_p3 = pnand %p598_p2, %p592_p13 }
  0x42   :  { %602 = shalt.err (!%p599_p3)
}
  0x43   :  { %65 = dma.hbm_to_vmem [thread:$0]  %s785_s5, 1024, %s60_s17, [#allocation9], %s634_s11, %s634_s11, %s635_s12  }
  0x44   :  { %625 = dma.done.wait [#allocation3], 64  }
  0x45   :  { %626 = vsyncadd [#allocation3], 4294967232 }
  0x46   :  { %627 = dma.done.wait [#allocation6], 1152  }
  0x47   :  { %628 = vsyncadd [#allocation6], 4294966144 }
  0x48   :  { %629 = dma.done.wait [#allocation9], 1024  }
  0x49   :  { %630 = vsyncadd [#allocation9], 4294966272  ;;  %v639_v0 = vmov 0.0   ;;  %vm640_vm0 = vmmov 0   ;;  %v494_v1 = vld [vmem:[#allocation5] sm:$0xff]   ;;  %vm97_vm1 = vcmask 130048  }
  0x4a   :  { %439 = vmatprep.subr.bf16.mxu0 %v639_v0  ;;  %441 = vmatprep.mubr.msk.bf16.mxu0 %vm640_vm0, %v639_v0  ;;  %v81_v2 = vld [vmem:[#allocation2] sm:$0xf]  ;;  %v495_v3 = vld [vmem:[#allocation7] sm:$0xff]   ;;  %v496_v4 = vld [vmem:[#allocation7 + $0x8] sm:$0xff]  }
  0x4b   :  { %445 = vmatprep.subr.bf16.mxu1 %v639_v0  ;;  %461 = vmatprep.mubr.msk.bf16.mxu1 %vm640_vm0, %v639_v0  ;;  %v497_v5 = vld [vmem:[#allocation7 + $0x10] sm:$0xff]   ;;  %v498_v6 = vld [vmem:[#allocation7 + $0x18] sm:$0xff]   ;;  %v499_v7 = vld [vmem:[#allocation7 + $0x20] sm:$0xff]  }
  0x4c   :  { %440 = vmatpush3.bf16.msra.mxu0 %v494_v1  ;;  %446 = vmatpush3.bf16.msra.mxu1 %v495_v3  ;;  %v500_v8 = vld [vmem:[#allocation7 + $0x28] sm:$0xff]   ;;  %v501_v9 = vld [vmem:[#allocation7 + $0x30] sm:$0xff]   ;;  %v502_v10 = vld [vmem:[#allocation7 + $0x38] sm:$0xff]  }
  0x4d   :  { %465 = vmatprep.subr.bf16.mxu0 %v639_v0  ;;  %447 = vmatprep.subr.bf16.mxu1 %v639_v0  ;;  %v503_v11 = vld [vmem:[#allocation8] sm:$0xff]   ;;  %v504_v12 = vld [vmem:[#allocation8 + $0x8] sm:$0xff]   ;;  %v505_v13 = vld [vmem:[#allocation8 + $0x10] sm:$0xff]  }
  0x4e   :  { %v506_v14 = vld [vmem:[#allocation8 + $0x18] sm:$0xff]   ;;  %v507_v15 = vld [vmem:[#allocation8 + $0x20] sm:$0xff]   ;;  %v508_v16 = vld [vmem:[#allocation8 + $0x28] sm:$0xff]  }
  0x4f   :  { %442 = vmatmul.mubr.msk.bf16.vlgmr.msra.gmra.mrb[0].mxu0 %vm97_vm1, %v81_v2  ;;  %v398_v17 = vld [vmem:[%s782_s2] ss:$0 sm:$0xff]  ;;  %v510_v27 = vld [vmem:[#allocation8 + $0x38] sm:$0xff]  }
  0x50   :  { %481 = vmatprep.mubr.msk.bf16.mxu0 %vm640_vm0, %v639_v0  ;;  %448 = vmatpush3.bf16.msra.mxu1 %v496_v4  ;;  %v509_v26 = vld [vmem:[#allocation8 + $0x30] sm:$0xff]  }
  0x51   :  { %449 = vmatprep.subr.bf16.mxu1 %v639_v0  ;;  %466 = vmatpush3.bf16.msra.mxu0 %v503_v11  ;;  %v401_v28 = vld [vmem:[%s784_s4] ss:$0 sm:$0xff]  ;;  %s641_s4 = smov [#allocation10]  }
  0x52   :  { %467 = vmatprep.subr.bf16.mxu0 %v639_v0  ;;  %v410_v37 = vld [vmem:[%s786_s6] ss:$0 sm:$0xff]  ;;  %s387_s28 = sshll.u32 %s641_s4, 4  ;;  %s388_s28 = int_to_ptr.vmem [resolvable:$true] %s387_s28 }
  0x53   :  { %s603_s6 = scalar_lea.vmem %s388_s28, 128  ;;  %p608_p5 = scmp.lt.s32.totalorder %s388_s28, %s388_s28 }
  0x54   :  { %450 = vmatpush3.bf16.msra.mxu1 %v497_v5  ;;  %p604_p4 = scmp.ne.s32.totalorder %s388_s28, %s603_s6  ;;  %p609_p6 = scmp.lt.s32.totalorder %s603_s6, %s603_s6 }
  0x55   :  { %451 = vmatprep.subr.bf16.mxu1 %v639_v0  ;;  %468 = vmatpush3.bf16.msra.mxu0 %v504_v12 }
  0x56   :  { %469 = vmatprep.subr.bf16.mxu0 %v639_v0  ;;  %p610_p7 = por %p609_p6, %p608_p5 }
  0x58   :  { %452 = vmatpush3.bf16.msra.mxu1 %v498_v6  ;;  %p611_p8 = pnand %p610_p7, %p604_p4 }
  0x59   :  { %453 = vmatprep.subr.bf16.mxu1 %v639_v0  ;;  %470 = vmatpush3.bf16.msra.mxu0 %v505_v13 }
  0x5a   :  { %471 = vmatprep.subr.bf16.mxu0 %v639_v0 }
  0x5c   :  { %454 = vmatpush3.bf16.msra.mxu1 %v499_v7 }
  0x5d   :  { %455 = vmatprep.subr.bf16.mxu1 %v639_v0  ;;  %472 = vmatpush3.bf16.msra.mxu0 %v506_v14 }
  0x5e   :  { %473 = vmatprep.subr.bf16.mxu0 %v639_v0 }
  0x60   :  { %456 = vmatpush3.bf16.msra.mxu1 %v500_v8 }
  0x61   :  { %457 = vmatprep.subr.bf16.mxu1 %v639_v0  ;;  %474 = vmatpush3.bf16.msra.mxu0 %v507_v15 }
  0x62   :  { %475 = vmatprep.subr.bf16.mxu0 %v639_v0 }
  0x64   :  { %458 = vmatpush3.bf16.msra.mxu1 %v501_v9 }
  0x65   :  { %459 = vmatprep.subr.bf16.mxu1 %v639_v0  ;;  %476 = vmatpush3.bf16.msra.mxu0 %v508_v16 }
  0x66   :  { %477 = vmatprep.subr.bf16.mxu0 %v639_v0 }
  0x68   :  { %460 = vmatpush3.bf16.msra.mxu1 %v502_v10 }
  0x69   :  { %478 = vmatpush3.bf16.msra.mxu0 %v509_v26 }
  0x6a   :  { %479 = vmatprep.subr.bf16.mxu0 %v639_v0 }
  0x6d   :  { %480 = vmatpush3.bf16.msra.mxu0 %v510_v27 }
 0x122   :  { %v135_v18 = vpop.f32.mrb[0].mxu0 }
 0x123   :  { %v136_v19 = vadd.f32 %v398_v17, %v135_v18  ;;  %v443_v20 = vpop.f32.mrb[1].mxu0 }
 0x124   :  { %v138_v21 = vpop.f32.mrb[2].mxu0 }
 0x125   :  { %vm141_vm2 = vcmp.ge.f32.partialorder %v136_v19, 0.0  ;;  %v142_v22 = vmul.f32 0.2, %v136_v19  ;;  %v444_v23 = vpop.f32.mrb[3].mxu0 }
 0x127   :  { %v143_v24 = vsel %vm141_vm2, %v136_v19, %v142_v22 }
 0x128   :  { %v144_v25 = vpack.c.bf16 %v143_v24, %v143_v24 }
 0x12a   :  { %462 = vmatmul.mubr.bf16.vlgmr.msra.gmra.mrb[0].mxu1 %v144_v25 }
 0x1fd   :  { %v250_v29 = vpop.f32.mrb[0].mxu1 }
 0x1fe   :  { %v251_v30 = vadd.f32 %v401_v28, %v250_v29  ;;  %v463_v31 = vpop.f32.mrb[1].mxu1 }
 0x1ff   :  { %v253_v32 = vpop.f32.mrb[2].mxu1 }
 0x200   :  { %vm256_vm3 = vcmp.ge.f32.partialorder %v251_v30, 0.0  ;;  %v257_v33 = vmul.f32 0.2, %v251_v30  ;;  %v464_v34 = vpop.f32.mrb[3].mxu1 }
 0x202   :  { %v258_v35 = vsel %vm256_vm3, %v251_v30, %v257_v33 }
 0x203   :  { %v259_v36 = vpack.c.bf16 %v258_v35, %v258_v35 }
 0x205   :  { %482 = vmatmul.mubr.bf16.vlgmr.msra.gmra.mrb[4].mxu0 %v259_v36 }
 0x2d8   :  { %v365_v38 = vpop.f32.mrb[4].mxu0 }
 0x2d9   :  { %v366_v39 = vadd.f32 %v410_v37, %v365_v38  ;;  %v483_v40 = vpop.f32.mrb[5].mxu0 }
 0x2da   :  { %v368_v41 = vpop.f32.mrb[6].mxu0 }
 0x2db   :  { %371 = vmax.xlane.f32.xlu0 %v366_v39  ;;  %v484_v42 = vpop.f32.mrb[7].mxu0 }
 0x368   :  { %v372_v43 = vpop.xlane.xlu0 %371 }
 0x369   :  { %v373_v44 = vsub.f32 %v366_v39, %v372_v43 }
 0x36b   :  { %v374_v45 = vmul.f32 1.442695, %v373_v44 }
 0x36d   :  { %511 = vpow2.f32 %v374_v45 }
 0x377   :  { %v512_v46 = vpop.eup %511 }
 0x378   :  { %376 = vadd.xlane.f32.xlu0 %v512_v46 }
 0x405   :  { %v377_v47 = vpop.xlane.xlu0 %376 }
 0x406   :  { %513 = vrcp.f32 %v377_v47 }
 0x410   :  { %v514_v48 = vpop.eup %513 }
 0x411   :  { %v379_v49 = vmul.f32 %v514_v48, %v512_v46 }
 0x413   :  { %380 = vst [vmem:[#allocation10] sm:$0xff] %v379_v49 }
 0x414   :  { %614 = shalt.err (!%p611_p8)
}
 0x415   :  { %s615_s8 = scalar_lea.hbm %s787_s7, 128 }
 0x416   :  { %p616_p9 = scmp.ne.s32.totalorder %s787_s7, %s615_s8  ;;  %p619_p10 = scmp.lt.u32.totalorder %s615_s8, %s787_s7 }
 0x418   :  { %p621_p11 = pnand %p619_p10, %p616_p9 }
 0x41a   :  { %624 = shalt.err (!%p621_p11)
}
 0x41b   :  { %390 = dma.vmem_to_hbm [thread:$0]  %s388_s28, 128, %s787_s7, [#allocation4]  }
 0x41c   :  { %631 = dma.done.wait [#allocation4], 128  }
 0x41d   :  { %632 = vsyncadd [#allocation4], 4294967168 }
 0x41e   :  { %394 = vsyncpa [#allocation3], 1 }
 0x41f   :  { %395 = vsyncpa [#allocation6], 1 }
 0x420   :  { %396 = vsyncpa [#allocation9], 1 }
 0x421   :  { %397 = vsyncpa [#allocation4], 1 }

// kernel: tpu_custom_call.1
= control target key start
LH: loop header
LB: loop body
LE: loop exit
PB: predicated region body
PF: predicated region fallthrough
CT: control target
= control target key end

     0   :  { %12 = vsyncpa [#allocation3], 0  ;;  %s780_s0 = inlined_call_operand.hbm [shape: bf16[8,16], index: 0, kind: input, shape index: {}]   ;;  %s781_s1 = inlined_call_operand.hbm [shape: bf16[16,128], index: 1, kind: input, shape index: {}]   ;;  %s782_s2 = inlined_call_operand.vmem [shape: f32[1,128], index: 2, kind: input, shape index: {}]   ;;  %s783_s3 = inlined_call_operand.hbm [shape: bf16[128,128], index: 3, kind: input, shape index: {}]   ;;  %s784_s4 = inlined_call_operand.vmem [shape: f32[1,128], index: 4, kind: input, shape index: {}]   ;;  %s785_s5 = inlined_call_operand.hbm [shape: bf16[128,128], index: 5, kind: input, shape index: {}]   ;;  %s786_s6 = inlined_call_operand.vmem [shape: f32[1,128], index: 6, kind: input, shape index: {}]   ;;  %s787_s7 = inlined_call_operand.hbm [shape: f32[8,128], index: 7, kind: output, shape index: {}]  }
   0x1   :  { %13 = vsyncpa [#allocation6], 0 }
   0x2   :  { %14 = vsyncpa [#allocation9], 0 }
   0x3   :  { %15 = vsyncpa [#allocation4], 0  ;;  %s633_s24 = smov [#allocation5]   ;;  %s515_s28 = scalar_lea.hbm %s781_s1, 128 }
   0x4   :  { %s31_s25 = sshll.u32 %s633_s24, 4  ;;  %p516_p0 = scmp.ne.s32.totalorder %s781_s1, %s515_s28  ;;  %s32_s25 = int_to_ptr.vmem [resolvable:$true] %s31_s25 }
   0x5   :  { %p519_p1 = scmp.lt.u32.totalorder %s515_s28, %s781_s1 }
   0x7   :  { %p521_p2 = pnand %p519_p1, %p516_p0 }
   0x9   :  { %524 = shalt.err (!%p521_p2)
}
   0xa   :  { %s525_s10 = scalar_lea.vmem %s32_s25, 128  ;;  %p530_p4 = scmp.lt.s32.totalorder %s32_s25, %s32_s25 }
   0xb   :  { %p526_p3 = scmp.ne.s32.totalorder %s32_s25, %s525_s10  ;;  %p531_p5 = scmp.lt.s32.totalorder %s525_s10, %s525_s10 }
   0xd   :  { %p532_p6 = por %p531_p5, %p530_p4 }
   0xf   :  { %p533_p7 = pnand %p532_p6, %p526_p3 }
  0x11   :  { %536 = shalt.err (!%p533_p7)
}
  0x12   :  { %s634_s11 = smov 64   ;;  %s635_s12 = smov 4  }
  0x13   :  { %37 = dma.hbm_to_vmem [thread:$0]  %s781_s1, 128, %s32_s25, [#allocation6], %s634_s11, %s634_s11, %s635_s12  }
  0x14   :  { %s636_s15 = smov [#allocation2]   ;;  %s637_s17 = smov [#allocation7]  }
  0x15   :  { %s22_s16 = sshll.u32 %s636_s15, 4  ;;  %s45_s18 = sshll.u32 %s637_s17, 4  ;;  %s23_s16 = int_to_ptr.vmem [resolvable:$true] %s22_s16  ;;  %s46_s18 = int_to_ptr.vmem [resolvable:$true] %s45_s18 }
  0x16   :  { %s537_s21 = scalar_lea.hbm %s780_s0, 64 }
  0x17   :  { %p538_p8 = scmp.ne.s32.totalorder %s780_s0, %s537_s21  ;;  %p541_p9 = scmp.lt.u32.totalorder %s537_s21, %s780_s0 }
  0x19   :  { %p543_p10 = pnand %p541_p9, %p538_p8 }
  0x1b   :  { %546 = shalt.err (!%p543_p10)
}
  0x1c   :  { %s547_s1 = scalar_lea.vmem %s23_s16, 64  ;;  %p552_p12 = scmp.lt.s32.totalorder %s23_s16, %s23_s16 }
  0x1d   :  { %p548_p11 = scmp.ne.s32.totalorder %s23_s16, %s547_s1  ;;  %p553_p13 = scmp.lt.s32.totalorder %s547_s1, %s547_s1 }
  0x1f   :  { %p554_p0 = por %p553_p13, %p552_p12 }
  0x21   :  { %p555_p1 = pnand %p554_p0, %p548_p11 }
  0x23   :  { %558 = shalt.err (!%p555_p1)
}
  0x24   :  { %25 = dma.hbm_to_vmem [thread:$0]  %s780_s0, 64, %s23_s16, [#allocation3]  }
  0x25   :  { %s559_s30 = scalar_lea.hbm %s783_s3, 1024 }
  0x26   :  { %p560_p2 = scmp.ne.s32.totalorder %s783_s3, %s559_s30  ;;  %p563_p3 = scmp.lt.u32.totalorder %s559_s30, %s783_s3 }
  0x28   :  { %p565_p4 = pnand %p563_p3, %p560_p2 }
  0x2a   :  { %568 = shalt.err (!%p565_p4)
}
  0x2b   :  { %s569_s14 = scalar_lea.vmem %s46_s18, 1024  ;;  %p574_p6 = scmp.lt.s32.totalorder %s46_s18, %s46_s18 }
  0x2c   :  { %p570_p5 = scmp.ne.s32.totalorder %s46_s18, %s569_s14  ;;  %p575_p7 = scmp.lt.s32.totalorder %s569_s14, %s569_s14 }
  0x2e   :  { %p576_p8 = por %p575_p7, %p574_p6 }
  0x30   :  { %p577_p9 = pnand %p576_p8, %p570_p5 }
  0x32   :  { %580 = shalt.err (!%p577_p9)
}
  0x33   :  { %51 = dma.hbm_to_vmem [thread:$0]  %s783_s3, 1024, %s46_s18, [#allocation6], %s634_s11, %s634_s11, %s635_s12  }
  0x34   :  { %s638_s16 = smov [#allocation8]   ;;  %s581_s21 = scalar_lea.hbm %s785_s5, 1024 }
  0x35   :  { %s59_s17 = sshll.u32 %s638_s16, 4  ;;  %p582_p10 = scmp.ne.s32.totalorder %s785_s5, %s581_s21  ;;  %s60_s17 = int_to_ptr.vmem [resolvable:$true] %s59_s17 }
  0x36   :  { %p585_p11 = scmp.lt.u32.totalorder %s581_s21, %s785_s5 }
  0x38   :  { %p587_p12 = pnand %p585_p11, %p582_p10 }
  0x3a   :  { %590 = shalt.err (!%p587_p12)
}
  0x3b   :  { %s591_s1 = scalar_lea.vmem %s60_s17, 1024  ;;  %p596_p0 = scmp.lt.s32.totalorder %s60_s17, %s60_s17 }
  0x3c   :  { %p592_p13 = scmp.ne.s32.totalorder %s60_s17, %s591_s1  ;;  %p597_p1 = scmp.lt.s32.totalorder %s591_s1, %s591_s1 }
  0x3e   :  { %p598_p2 = por %p597_p1, %p596_p0 }
  0x40   :  { %p599_p3 = pnand %p598_p2, %p592_p13 }
  0x42   :  { %602 = shalt.err (!%p599_p3)
}
  0x43   :  { %65 = dma.hbm_to_vmem [thread:$0]  %s785_s5, 1024, %s60_s17, [#allocation9], %s634_s11, %s634_s11, %s635_s12  }
  0x44   :  { %625 = dma.done.wait [#allocation3], 64  }
  0x45   :  { %626 = vsyncadd [#allocation3], 4294967232 }
  0x46   :  { %627 = dma.done.wait [#allocation6], 1152  }
  0x47   :  { %628 = vsyncadd [#allocation6], 4294966144 }
  0x48   :  { %629 = dma.done.wait [#allocation9], 1024  }
  0x49   :  { %630 = vsyncadd [#allocation9], 4294966272  ;;  %v639_v0 = vmov 0.0   ;;  %vm640_vm0 = vmmov 0   ;;  %v494_v1 = vld [vmem:[#allocation5] sm:$0xff]   ;;  %vm97_vm1 = vcmask 130048  }
  0x4a   :  { %439 = vmatprep.subr.bf16.mxu0 %v639_v0  ;;  %441 = vmatprep.mubr.msk.bf16.mxu0 %vm640_vm0, %v639_v0  ;;  %v81_v2 = vld [vmem:[#allocation2] sm:$0xf]  ;;  %v495_v3 = vld [vmem:[#allocation7] sm:$0xff]   ;;  %v496_v4 = vld [vmem:[#allocation7 + $0x8] sm:$0xff]  }
  0x4b   :  { %445 = vmatprep.subr.bf16.mxu1 %v639_v0  ;;  %461 = vmatprep.mubr.msk.bf16.mxu1 %vm640_vm0, %v639_v0  ;;  %v497_v5 = vld [vmem:[#allocation7 + $0x10] sm:$0xff]   ;;  %v498_v6 = vld [vmem:[#allocation7 + $0x18] sm:$0xff]   ;;  %v499_v7 = vld [vmem:[#allocation7 + $0x20] sm:$0xff]  }
  0x4c   :  { %440 = vmatpush3.bf16.msra.mxu0 %v494_v1  ;;  %446 = vmatpush3.bf16.msra.mxu1 %v495_v3  ;;  %v500_v8 = vld [vmem:[#allocation7 + $0x28] sm:$0xff]   ;;  %v501_v9 = vld [vmem:[#allocation7 + $0x30] sm:$0xff]   ;;  %v502_v10 = vld [vmem:[#allocation7 + $0x38] sm:$0xff]  }
  0x4d   :  { %465 = vmatprep.subr.bf16.mxu0 %v639_v0  ;;  %447 = vmatprep.subr.bf16.mxu1 %v639_v0  ;;  %v503_v11 = vld [vmem:[#allocation8] sm:$0xff]   ;;  %v504_v12 = vld [vmem:[#allocation8 + $0x8] sm:$0xff]   ;;  %v505_v13 = vld [vmem:[#allocation8 + $0x10] sm:$0xff]  }
  0x4e   :  { %v506_v14 = vld [vmem:[#allocation8 + $0x18] sm:$0xff]   ;;  %v507_v15 = vld [vmem:[#allocation8 + $0x20] sm:$0xff]   ;;  %v508_v16 = vld [vmem:[#allocation8 + $0x28] sm:$0xff]  }
  0x4f   :  { %442 = vmatmul.mubr.msk.bf16.vlgmr.msra.gmra.mrb[0].mxu0 %vm97_vm1, %v81_v2  ;;  %v398_v17 = vld [vmem:[%s782_s2] ss:$0 sm:$0xff]  ;;  %v510_v27 = vld [vmem:[#allocation8 + $0x38] sm:$0xff]  }
  0x50   :  { %481 = vmatprep.mubr.msk.bf16.mxu0 %vm640_vm0, %v639_v0  ;;  %448 = vmatpush3.bf16.msra.mxu1 %v496_v4  ;;  %v509_v26 = vld [vmem:[#allocation8 + $0x30] sm:$0xff]  }
  0x51   :  { %449 = vmatprep.subr.bf16.mxu1 %v639_v0  ;;  %466 = vmatpush3.bf16.msra.mxu0 %v503_v11  ;;  %v401_v28 = vld [vmem:[%s784_s4] ss:$0 sm:$0xff]  ;;  %s641_s4 = smov [#allocation10]  }
  0x52   :  { %467 = vmatprep.subr.bf16.mxu0 %v639_v0  ;;  %v410_v37 = vld [vmem:[%s786_s6] ss:$0 sm:$0xff]  ;;  %s387_s28 = sshll.u32 %s641_s4, 4  ;;  %s388_s28 = int_to_ptr.vmem [resolvable:$true] %s387_s28 }
  0x53   :  { %s603_s6 = scalar_lea.vmem %s388_s28, 128  ;;  %p608_p5 = scmp.lt.s32.totalorder %s388_s28, %s388_s28 }
  0x54   :  { %450 = vmatpush3.bf16.msra.mxu1 %v497_v5  ;;  %p604_p4 = scmp.ne.s32.totalorder %s388_s28, %s603_s6  ;;  %p609_p6 = scmp.lt.s32.totalorder %s603_s6, %s603_s6 }
  0x55   :  { %451 = vmatprep.subr.bf16.mxu1 %v639_v0  ;;  %468 = vmatpush3.bf16.msra.mxu0 %v504_v12 }
  0x56   :  { %469 = vmatprep.subr.bf16.mxu0 %v639_v0  ;;  %p610_p7 = por %p609_p6, %p608_p5 }
  0x58   :  { %452 = vmatpush3.bf16.msra.mxu1 %v498_v6  ;;  %p611_p8 = pnand %p610_p7, %p604_p4 }
  0x59   :  { %453 = vmatprep.subr.bf16.mxu1 %v639_v0  ;;  %470 = vmatpush3.bf16.msra.mxu0 %v505_v13 }
  0x5a   :  { %471 = vmatprep.subr.bf16.mxu0 %v639_v0 }
  0x5c   :  { %454 = vmatpush3.bf16.msra.mxu1 %v499_v7 }
  0x5d   :  { %455 = vmatprep.subr.bf16.mxu1 %v639_v0  ;;  %472 = vmatpush3.bf16.msra.mxu0 %v506_v14 }
  0x5e   :  { %473 = vmatprep.subr.bf16.mxu0 %v639_v0 }
  0x60   :  { %456 = vmatpush3.bf16.msra.mxu1 %v500_v8 }
  0x61   :  { %457 = vmatprep.subr.bf16.mxu1 %v639_v0  ;;  %474 = vmatpush3.bf16.msra.mxu0 %v507_v15 }
  0x62   :  { %475 = vmatprep.subr.bf16.mxu0 %v639_v0 }
  0x64   :  { %458 = vmatpush3.bf16.msra.mxu1 %v501_v9 }
  0x65   :  { %459 = vmatprep.subr.bf16.mxu1 %v639_v0  ;;  %476 = vmatpush3.bf16.msra.mxu0 %v508_v16 }
  0x66   :  { %477 = vmatprep.subr.bf16.mxu0 %v639_v0 }
  0x68   :  { %460 = vmatpush3.bf16.msra.mxu1 %v502_v10 }
  0x69   :  { %478 = vmatpush3.bf16.msra.mxu0 %v509_v26 }
  0x6a   :  { %479 = vmatprep.subr.bf16.mxu0 %v639_v0 }
  0x6d   :  { %480 = vmatpush3.bf16.msra.mxu0 %v510_v27 }
 0x122   :  { %v135_v18 = vpop.f32.mrb[0].mxu0 }
 0x123   :  { %v136_v19 = vadd.f32 %v398_v17, %v135_v18  ;;  %v443_v20 = vpop.f32.mrb[1].mxu0 }
 0x124   :  { %v138_v21 = vpop.f32.mrb[2].mxu0 }
 0x125   :  { %vm141_vm2 = vcmp.ge.f32.partialorder %v136_v19, 0.0  ;;  %v142_v22 = vmul.f32 0.2, %v136_v19  ;;  %v444_v23 = vpop.f32.mrb[3].mxu0 }
 0x127   :  { %v143_v24 = vsel %vm141_vm2, %v136_v19, %v142_v22 }
 0x128   :  { %v144_v25 = vpack.c.bf16 %v143_v24, %v143_v24 }
 0x12a   :  { %462 = vmatmul.mubr.bf16.vlgmr.msra.gmra.mrb[0].mxu1 %v144_v25 }
 0x1fd   :  { %v250_v29 = vpop.f32.mrb[0].mxu1 }
 0x1fe   :  { %v251_v30 = vadd.f32 %v401_v28, %v250_v29  ;;  %v463_v31 = vpop.f32.mrb[1].mxu1 }
 0x1ff   :  { %v253_v32 = vpop.f32.mrb[2].mxu1 }
 0x200   :  { %vm256_vm3 = vcmp.ge.f32.partialorder %v251_v30, 0.0  ;;  %v257_v33 = vmul.f32 0.2, %v251_v30  ;;  %v464_v34 = vpop.f32.mrb[3].mxu1 }
 0x202   :  { %v258_v35 = vsel %vm256_vm3, %v251_v30, %v257_v33 }
 0x203   :  { %v259_v36 = vpack.c.bf16 %v258_v35, %v258_v35 }
 0x205   :  { %482 = vmatmul.mubr.bf16.vlgmr.msra.gmra.mrb[4].mxu0 %v259_v36 }
 0x2d8   :  { %v365_v38 = vpop.f32.mrb[4].mxu0 }
 0x2d9   :  { %v366_v39 = vadd.f32 %v410_v37, %v365_v38  ;;  %v483_v40 = vpop.f32.mrb[5].mxu0 }
 0x2da   :  { %v368_v41 = vpop.f32.mrb[6].mxu0 }
 0x2db   :  { %371 = vmax.xlane.f32.xlu0 %v366_v39  ;;  %v484_v42 = vpop.f32.mrb[7].mxu0 }
 0x368   :  { %v372_v43 = vpop.xlane.xlu0 %371 }
 0x369   :  { %v373_v44 = vsub.f32 %v366_v39, %v372_v43 }
 0x36b   :  { %v374_v45 = vmul.f32 1.442695, %v373_v44 }
 0x36d   :  { %511 = vpow2.f32 %v374_v45 }
 0x377   :  { %v512_v46 = vpop.eup %511 }
 0x378   :  { %376 = vadd.xlane.f32.xlu0 %v512_v46 }
 0x405   :  { %v377_v47 = vpop.xlane.xlu0 %376 }
 0x406   :  { %513 = vrcp.f32 %v377_v47 }
 0x410   :  { %v514_v48 = vpop.eup %513 }
 0x411   :  { %v379_v49 = vmul.f32 %v514_v48, %v512_v46 }
 0x413   :  { %380 = vst [vmem:[#allocation10] sm:$0xff] %v379_v49 }
 0x414   :  { %614 = shalt.err (!%p611_p8)
}
 0x415   :  { %s615_s8 = scalar_lea.hbm %s787_s7, 128 }
 0x416   :  { %p616_p9 = scmp.ne.s32.totalorder %s787_s7, %s615_s8  ;;  %p619_p10 = scmp.lt.u32.totalorder %s615_s8, %s787_s7 }
 0x418   :  { %p621_p11 = pnand %p619_p10, %p616_p9 }
 0x41a   :  { %624 = shalt.err (!%p621_p11)
}
 0x41b   :  { %390 = dma.vmem_to_hbm [thread:$0]  %s388_s28, 128, %s787_s7, [#allocation4]  }
 0x41c   :  { %631 = dma.done.wait [#allocation4], 128  }
 0x41d   :  { %632 = vsyncadd [#allocation4], 4294967168 }
 0x41e   :  { %394 = vsyncpa [#allocation3], 1 }
 0x41f   :  { %395 = vsyncpa [#allocation6], 1 }
 0x420   :  { %396 = vsyncpa [#allocation9], 1 }
 0x421   :  { %397 = vsyncpa [#allocation4], 1 }

</bundles_post_ra>
